<compile_context>
chip_gen: v6e
topology: v6e:2x2x1
jax: 0.10.0
libtpu: 0.0.40
codegen_flags: <defaults>
</compile_context>

<pallas_src>
import functools

import jax
import jax.numpy as jnp
from jax.experimental import pallas as pl
from jax.experimental.pallas import tpu as pltpu


# ------------------------------ helpers -------------------------------------
def _vmem_budget_bytes():
    """Physical VMEM per TensorCore minus headroom for Mosaic internals."""
    cap = 64 * 1024 * 1024            # conservative fallback (v7x-safe)
    try:
        cap = int(getattr(pltpu.get_tpu_info(), "vmem_capacity_bytes", cap))
    except Exception:
        pass
    return max(cap - 16 * 1024 * 1024, 16 * 1024 * 1024)


def _round_up(x, m):
    return ((x + m - 1) // m) * m


def _pick_tile(n, candidates):
    """Largest candidate tile that evenly divides n, else the full dim."""
    for c in candidates:
        if n >= c and n % c == 0:
            return c
    return n


def _fused_vmem_need(tm, H, out_dim_p, x_itm, w_itm, weight_resident):
    w_cols = out_dim_p if weight_resident else min(out_dim_p, 512)
    return (2 * tm * H * x_itm                 # x tile double-buffer
            + 2 * H * w_cols * w_itm           # W_lin (resident or streamed)
            + 2 * tm * out_dim_p * x_itm       # output tile double-buffer
            + 3 * tm * H * 4                   # f32 LN/modulate temporaries
            + tm * H * w_itm                   # scratch (tiled path) / slack
            + 4 * (2 * H + out_dim_p) * 4)     # mod row + bias


def _pick_tm(B, S, H, out_dim_p, x_itm, w_itm, budget, weight_resident):
    cands = [c for c in (1024, 512, 256, 128, 64, 32, 16, 8)
             if c <= S and S % c == 0]
    if not cands:
        cands = [S]                            # odd / tiny S: best effort
    tm = cands[-1]
    for c in cands:                            # biggest tile that fits VMEM
        if _fused_vmem_need(c, H, out_dim_p, x_itm, w_itm,
                            weight_resident) <= budget:
            tm = c
            break
    # v7x megacore: keep at least 2 parallel grid steps when possible.
    while (B * (S // tm) < 2 and tm >= 16 and tm % 2 == 0
           and S % (tm // 2) == 0):
        tm //= 2
    return tm


# --------------------------- adaLN modulation --------------------------------
def _adaln_kernel(k_ref, w_ref, b_ref, o_ref):
    # silu(key) @ W_mod + b_mod for one N tile (SiLU recompute is free filler
    # in a W_mod-streaming-bound kernel).
    k = k_ref[...].astype(jnp.float32)
    silu = (k * jax.nn.sigmoid(k)).astype(w_ref.dtype)
    acc = jnp.dot(silu, w_ref[...], preferred_element_type=jnp.float32)
    o_ref[...] = (acc + b_ref[...].astype(jnp.float32)).astype(o_ref.dtype)


def _adaln_forward(key, w_mod_t, b_mod):
    B, H = key.shape
    two_h = w_mod_t.shape[1]
    tn = _pick_tile(two_h, (1024, 512))        # keep W_mod DMA chunks large
    n_steps = two_h // tn
    bias2d = b_mod.reshape(1, two_h)
    budget = _vmem_budget_bytes()

    itm_w = w_mod_t.dtype.itemsize
    itm_x = key.dtype.itemsize
    need = (3 * H * tn * itm_w                 # streamed weight (<=3 buffers)
            + B * H * itm_x                    # resident key
            + 2 * B * tn * itm_x               # output double-buffer
            + 2 * tn * bias2d.dtype.itemsize
            + B * tn * 4)                      # f32 accumulator temp
    vmem = int(min(max(1.5 * need, 32 * 1024 * 1024), budget))

    w_kwargs = {}
    if n_steps >= 3:
        # Deeper buffering hides the W_mod stream (mainly helps v5e).
        w_kwargs["pipeline_mode"] = pl.Buffered(3)

    return pl.pallas_call(
        _adaln_kernel,
        out_shape=jax.ShapeDtypeStruct((B, two_h), key.dtype),
        grid_spec=pltpu.PrefetchScalarGridSpec(
            num_scalar_prefetch=0,
            grid=(n_steps,),
            in_specs=[
                pl.BlockSpec((B, H), lambda n: (0, 0)),               # key resident
                pl.BlockSpec((H, tn), lambda n: (0, n), **w_kwargs),  # W_mod stream
                pl.BlockSpec((1, tn), lambda n: (0, n)),
            ],
            out_specs=pl.BlockSpec((B, tn), lambda n: (0, n)),
        ),
        compiler_params=pltpu.CompilerParams(
            dimension_semantics=("parallel",),
            vmem_limit_bytes=vmem,
        ),
        cost_estimate=pl.CostEstimate(
            flops=2 * B * H * two_h,
            transcendentals=B * H,
            bytes_accessed=(key.size * itm_x + w_mod_t.size * itm_w
                            + bias2d.size * bias2d.dtype.itemsize
                            + B * two_h * itm_x),
        ),
    )(key, w_mod_t, bias2d)


# -------------- fused LayerNorm + modulate + Linear (resident W) -------------
def _fused_resident_kernel(x_ref, mod_ref, w_ref, b_ref, o_ref, *, eps, hidden):
    xf = x_ref[0].astype(jnp.float32)                     # (TM, H)
    mean = jnp.mean(xf, axis=-1, keepdims=True)           # (TM, 1)
    m2 = jnp.mean(xf * xf, axis=-1, keepdims=True)        # (TM, 1)
    var = jnp.maximum(m2 - mean * mean, 0.0)
    rstd = jax.lax.rsqrt(var + eps)                       # (TM, 1)

    modrow = mod_ref[0].astype(jnp.float32)               # (1, 2H)
    onep_shift = 1.0 + modrow[:, :hidden]                 # (1, H)
    scale = modrow[:, hidden:]                            # (1, H)

    # (1 + shift) * LayerNorm(x) + scale, folded as a per-row affine on x.
    modded = (xf * rstd - mean * rstd) * onep_shift + scale

    acc = jnp.dot(modded.astype(w_ref.dtype), w_ref[...],
                  preferred_element_type=jnp.float32)
    o_ref[0] = (acc + b_ref[...].astype(jnp.float32)).astype(o_ref.dtype)


def _fused_resident(x, mod, w_lin_p, bias2d, *, eps, budget):
    B, S, H = x.shape
    out_dim_p = w_lin_p.shape[1]
    x_itm = x.dtype.itemsize
    w_itm = w_lin_p.dtype.itemsize
    tm = _pick_tm(B, S, H, out_dim_p, x_itm, w_itm, budget, weight_resident=True)
    need = _fused_vmem_need(tm, H, out_dim_p, x_itm, w_itm, True)
    vmem = int(min(max(1.5 * need, 32 * 1024 * 1024), budget))

    kernel = functools.partial(_fused_resident_kernel, eps=eps, hidden=H)
    return pl.pallas_call(
        kernel,
        out_shape=jax.ShapeDtypeStruct((B, S, out_dim_p), x.dtype),
        grid_spec=pltpu.PrefetchScalarGridSpec(
            num_scalar_prefetch=0,
            grid=(B, S // tm),
            in_specs=[
                pl.BlockSpec((1, tm, H), lambda b, m: (b, m, 0)),      # x streamed
                pl.BlockSpec((1, 1, 2 * H), lambda b, m: (b, 0, 0)),   # mod row
                pl.BlockSpec((H, out_dim_p), lambda b, m: (0, 0)),     # W resident
                pl.BlockSpec((1, out_dim_p), lambda b, m: (0, 0)),     # bias resident
            ],
            out_specs=pl.BlockSpec((1, tm, out_dim_p), lambda b, m: (b, m, 0)),
        ),
        compiler_params=pltpu.CompilerParams(
            dimension_semantics=("parallel", "parallel"),
            vmem_limit_bytes=vmem,
        ),
        cost_estimate=pl.CostEstimate(
            flops=2 * B * S * H * out_dim_p + 8 * B * S * H,
            transcendentals=B * S,
            bytes_accessed=(x.size * x_itm + mod.size * mod.dtype.itemsize
                            + w_lin_p.size * w_itm
                            + bias2d.size * bias2d.dtype.itemsize
                            + B * S * out_dim_p * x_itm),
        ),
    )(x, mod, w_lin_p, bias2d)


# ------------- fused kernel, tiled-N fallback (very large out_dim) -----------
def _fused_tiled_kernel(x_ref, mod_ref, w_ref, b_ref, o_ref, mscr_ref, *,
                        eps, hidden):
    @pl.when(pl.program_id(2) == 0)
    def _():
        xf = x_ref[0].astype(jnp.float32)
        mean = jnp.mean(xf, axis=-1, keepdims=True)
        m2 = jnp.mean(xf * xf, axis=-1, keepdims=True)
        var = jnp.maximum(m2 - mean * mean, 0.0)
        rstd = jax.lax.rsqrt(var + eps)
        modrow = mod_ref[0].astype(jnp.float32)
        onep_shift = 1.0 + modrow[:, :hidden]
        scale = modrow[:, hidden:]
        mscr_ref[...] = ((xf * rstd - mean * rstd) * onep_shift + scale
                         ).astype(mscr_ref.dtype)

    acc = jnp.dot(mscr_ref[...].astype(w_ref.dtype), w_ref[...],
                  preferred_element_type=jnp.float32)
    o_ref[0] = (acc + b_ref[...].astype(jnp.float32)).astype(o_ref.dtype)


def _fused_tiled(x, mod, w_lin_p, bias2d, *, eps, budget):
    B, S, H = x.shape
    out_dim_p = w_lin_p.shape[1]
    x_itm = x.dtype.itemsize
    w_itm = w_lin_p.dtype.itemsize
    tn = _pick_tile(out_dim_p, (512, 256, 128))
    tm = _pick_tm(B, S, H, out_dim_p, x_itm, w_itm, budget, weight_resident=False)
    need = _fused_vmem_need(tm, H, out_dim_p, x_itm, w_itm, False)
    vmem = int(min(max(1.5 * need, 32 * 1024 * 1024), budget))

    kernel = functools.partial(_fused_tiled_kernel, eps=eps, hidden=H)
    return pl.pallas_call(
        kernel,
        out_shape=jax.ShapeDtypeStruct((B, S, out_dim_p), x.dtype),
        grid_spec=pltpu.PrefetchScalarGridSpec(
            num_scalar_prefetch=0,
            grid=(B, S // tm, out_dim_p // tn),
            in_specs=[
                pl.BlockSpec((1, tm, H), lambda b, m, n: (b, m, 0)),
                pl.BlockSpec((1, 1, 2 * H), lambda b, m, n: (b, 0, 0)),
                pl.BlockSpec((H, tn), lambda b, m, n: (0, n)),         # W stream
                pl.BlockSpec((1, tn), lambda b, m, n: (0, n)),
            ],
            out_specs=pl.BlockSpec((1, tm, tn), lambda b, m, n: (b, m, n)),
            scratch_shapes=[pltpu.VMEM((tm, H), x.dtype)],             # LN+mod acts
        ),
        compiler_params=pltpu.CompilerParams(
            dimension_semantics=("parallel", "parallel", "arbitrary"),
            vmem_limit_bytes=vmem,
        ),
        cost_estimate=pl.CostEstimate(
            flops=2 * B * S * H * out_dim_p + 8 * B * S * H,
            transcendentals=B * S,
            bytes_accessed=(x.size * x_itm + mod.size * mod.dtype.itemsize
                            + B * (S // tm) * w_lin_p.size * w_itm
                            + bias2d.size * bias2d.dtype.itemsize
                            + B * S * out_dim_p * x_itm),
        ),
    )(x, mod, w_lin_p, bias2d)


# ------------------------------ public entry ---------------------------------
def last_layer_forward(x, key, w_mod_t, b_mod, w_lin_t, b_lin, *, eps=1e-6):
    """x: (B, S, H); key: (B, H); w_mod_t: (H, 2H); w_lin_t: (H, out_dim).

    Weights are the transposes of the PyTorch nn.Linear weights; they may be
    stored in bf16 and are streamed to the MXU without an f32 cast.
    """
    B, S, H = x.shape
    assert key.shape == (B, H)
    two_h = w_mod_t.shape[1]
    assert two_h == 2 * H and b_mod.shape == (two_h,)
    out_dim = w_lin_t.shape[1]
    assert w_lin_t.shape == (H, out_dim) and b_lin.shape == (out_dim,)

    # 1) adaLN modulation: (B, 2H) kept as ONE tensor; split inside the kernel
    #    (avoids two extra HBM materializations / DMA streams).
    mod = _adaln_forward(key, w_mod_t, b_mod).reshape(B, 1, two_h)

    # 2) lane-dense output: pad out_dim up to a multiple of 128 (unmasked vst,
    #    MXU-friendly N); padding sliced off below.
    out_dim_p = _round_up(out_dim, 128)
    if out_dim_p != out_dim:
        w_lin_p = jnp.pad(w_lin_t, ((0, 0), (0, out_dim_p - out_dim)))
        b_lin_p = jnp.pad(b_lin, (0, out_dim_p - out_dim))
    else:
        w_lin_p, b_lin_p = w_lin_t, b_lin
    bias2d = b_lin_p.reshape(1, out_dim_p)

    budget = _vmem_budget_bytes()
    w_bytes = H * out_dim_p * w_lin_p.dtype.itemsize
    resident_ok = 2 * w_bytes <= budget // 3   # typical LastLayer: always true

    if resident_ok:
        out_p = _fused_resident(x, mod, w_lin_p, bias2d, eps=eps, budget=budget)
    else:
        out_p = _fused_tiled(x, mod, w_lin_p, bias2d, eps=eps, budget=budget)

    return out_p[..., :out_dim] if out_dim_p != out_dim else out_p


# ------------------------------- reference -----------------------------------
def _reference(x, key, w_mod_t, b_mod, w_lin_t, b_lin, eps=1e-6):
    """Pure-JAX mirror of the PyTorch forward (f32 math)."""
    H = x.shape[-1]
    kf = key.astype(jnp.float32)
    mod = (kf * jax.nn.sigmoid(kf)) @ w_mod_t.astype(jnp.float32) \
        + b_mod.astype(jnp.float32)
    shift = mod[:, None, :H]
    scale = mod[:, None, H:]
    xf = x.astype(jnp.float32)
    mean = xf.mean(-1, keepdims=True)
    var = ((xf - mean) ** 2).mean(-1, keepdims=True)
    normed = (xf - mean) * jax.lax.rsqrt(var + eps)
    modded = (1.0 + shift) * normed + scale           # matches swapped modulate()
    out = modded @ w_lin_t.astype(jnp.float32) + b_lin.astype(jnp.float32)
    return out.astype(x.dtype)


if __name__ == "__main__":
    B, S, H = 2, 8, 32                 # batch, seq, hidden_size
    patch, out_ch = 2, 4
    out_dim = patch * patch * out_ch   # 16

    rng = jax.random.PRNGKey(0)
    k_x, k_key, k_wm, k_bm, k_wl, k_bl = jax.random.split(rng, 6)

    x = jax.random.normal(k_x, (B, S, H), dtype=jnp.float32)
    key = jax.random.normal(k_key, (B, H), dtype=jnp.float32)

    bound = 1.0 / (H ** 0.5)
    w_mod_t = jax.random.uniform(k_wm, (H, 2 * H), jnp.float32, -bound, bound)
    b_mod = jax.random.uniform(k_bm, (2 * H,), jnp.float32, -bound, bound)
    w_lin_t = jax.random.uniform(k_wl, (H, out_dim), jnp.float32, -bound, bound)
    b_lin = jax.random.uniform(k_bl, (out_dim,), jnp.float32, -bound, bound)

    out = last_layer_forward(x, key, w_mod_t, b_mod, w_lin_t, b_lin)
    jax.block_until_ready(out)

    ref = _reference(x, key, w_mod_t, b_mod, w_lin_t, b_lin)
    assert out.shape == (B, S, out_dim), out.shape
    max_err = float(jnp.max(jnp.abs(out.astype(jnp.float32)
                                    - ref.astype(jnp.float32))))
    assert jnp.allclose(out, ref, atol=1e-4, rtol=1e-4), \
        f"mismatch vs reference: {max_err}"

    print("KERNEL_OK")
</pallas_src>

<mosaic_0001>
module attributes {stable_mosaic.version = 11 : i64} {
  func.func @_adaln_kernel(%arg0: i32, %arg1: memref<2x32xf32, #tpu.memory_space<vmem>>, %arg2: memref<32x64xf32, #tpu.memory_space<vmem>>, %arg3: memref<1x64xf32, #tpu.memory_space<vmem>>, %arg4: memref<2x64xf32, #tpu.memory_space<vmem>>) attributes {dimension_semantics = [#tpu.dimension_semantics<parallel>], iteration_bounds = array<i64: 1>, scalar_prefetch = 0 : i64, scratch_operands = 0 : i64, tpu.core_type = #tpu.core_type<tc>, window_params = [{pipeline_mode = #tpu.pipeline_mode<synchronous>, transform_indices = @transform_0, window_bounds = array<i64: 2, 32>}, {transform_indices = @transform_1, window_bounds = array<i64: 32, 64>}, {transform_indices = @transform_2, window_bounds = array<i64: 1, 64>}, {transform_indices = @transform_3, window_bounds = array<i64: 2, 64>}]} {
    %c0 = arith.constant 0 : index
    %c0_0 = arith.constant 0 : index
    %0 = vector.load %arg1[%c0, %c0_0] : memref<2x32xf32, #tpu.memory_space<vmem>>, vector<2x32xf32>
    %1 = arith.negf %0 : vector<2x32xf32>
    %2 = math.exp %1 : vector<2x32xf32>
    %cst = arith.constant 1.000000e+00 : f32
    %3 = vector.broadcast %cst : f32 to vector<2x32xf32>
    %4 = arith.addf %3, %2 : vector<2x32xf32>
    %5 = arith.divf %3, %4 : vector<2x32xf32>
    %6 = arith.mulf %0, %5 : vector<2x32xf32>
    %c0_1 = arith.constant 0 : index
    %c0_2 = arith.constant 0 : index
    %7 = vector.load %arg2[%c0_1, %c0_2] : memref<32x64xf32, #tpu.memory_space<vmem>>, vector<32x64xf32>
    %cst_3 = arith.constant dense<0.000000e+00> : vector<2x64xf32>
    %8 = tpu.matmul %6, %7, %cst_3 {dimension_numbers = #tpu.dot_dimension_numbers<[1], [0], [0], [1], [0, 0, 1, 1], [], []>} : vector<2x32xf32>, vector<32x64xf32>, vector<2x64xf32> -> vector<2x64xf32>
    %c0_4 = arith.constant 0 : index
    %c0_5 = arith.constant 0 : index
    %9 = vector.load %arg3[%c0_4, %c0_5] : memref<1x64xf32, #tpu.memory_space<vmem>>, vector<1x64xf32>
    %10 = vector.broadcast %9 : vector<1x64xf32> to vector<2x64xf32>
    %11 = arith.addf %8, %10 : vector<2x64xf32>
    %c0_6 = arith.constant 0 : index
    %c0_7 = arith.constant 0 : index
    %12 = vector.load %arg4[%c0_6, %c0_7] : memref<2x64xf32, #tpu.memory_space<vmem>>, vector<2x64xf32>
    tpu.vector_store %arg4[%c0_6, %c0_7], %11 {strides = array<i32>} : memref<2x64xf32, #tpu.memory_space<vmem>>, vector<2x64xf32>,
    return
  }
  func.func @transform_0(%arg0: i32) -> (i32, i32) {
    %c0_i32 = arith.constant 0 : i32
    %c0_i32_0 = arith.constant 0 : i32
    %c0_i32_1 = arith.constant 0 : i32
    return %c0_i32, %c0_i32_0 : i32, i32
  }
  func.func @transform_1(%arg0: i32) -> (i32, i32) {
    %c0_i32 = arith.constant 0 : i32
    %c0_i32_0 = arith.constant 0 : i32
    return %c0_i32, %arg0 : i32, i32
  }
  func.func @transform_2(%arg0: i32) -> (i32, i32) {
    %c0_i32 = arith.constant 0 : i32
    %c0_i32_0 = arith.constant 0 : i32
    return %c0_i32, %arg0 : i32, i32
  }
  func.func @transform_3(%arg0: i32) -> (i32, i32) {
    %c0_i32 = arith.constant 0 : i32
    %c0_i32_0 = arith.constant 0 : i32
    return %c0_i32, %arg0 : i32, i32
  }
}

</mosaic_0001>

<bundles_post_ra>
// kernel: tpu_custom_call.1
= control target key start
LH: loop header
LB: loop body
LE: loop exit
PB: predicated region body
PF: predicated region fallthrough
CT: control target
= control target key end

     0   :  { %8 = vsyncpa [#allocation3], 0  ;;  %s287_s0 = inlined_call_operand.hbm [shape: f32[2,32], index: 0, kind: input, shape index: {}]   ;;  %s288_s1 = inlined_call_operand.hbm [shape: f32[32,64], index: 1, kind: input, shape index: {}]   ;;  %s289_s2 = inlined_call_operand.vmem [shape: f32[1,64], index: 2, kind: input, shape index: {}]   ;;  %s290_s3 = inlined_call_operand.hbm [shape: f32[2,64], index: 3, kind: output, shape index: {}]  }
   0x1   :  { %9 = vsyncpa [#allocation6], 0 }
   0x2   :  { %10 = vsyncpa [#allocation4], 0  ;;  %s248_s12 = smov [#allocation2]   ;;  %s249_s14 = smov [#allocation5]  }
   0x3   :  { %s17_s13 = sshll.u32 %s248_s12, 4  ;;  %s26_s15 = sshll.u32 %s249_s14, 4  ;;  %s18_s13 = int_to_ptr.vmem [resolvable:$true] %s17_s13  ;;  %s27_s15 = int_to_ptr.vmem [resolvable:$true] %s26_s15 }
   0x4   :  { %s190_s16 = scalar_lea.vmem %s18_s13, 32  ;;  %p195_p1 = scmp.lt.s32.totalorder %s18_s13, %s18_s13 }
   0x5   :  { %p191_p0 = scmp.ne.s32.totalorder %s18_s13, %s190_s16  ;;  %p196_p2 = scmp.lt.s32.totalorder %s190_s16, %s190_s16 }
   0x7   :  { %p197_p3 = por %p196_p2, %p195_p1 }
   0x9   :  { %p198_p4 = pnand %p197_p3, %p191_p0 }
   0xb   :  { %201 = shalt.err (!%p198_p4)
}
   0xc   :  { %20 = dma.hbm_to_vmem [thread:$0]  %s287_s0, 32, %s18_s13, [#allocation3]  }
   0xd   :  { %s210_s19 = scalar_lea.vmem %s27_s15, 512  ;;  %p215_p6 = scmp.lt.s32.totalorder %s27_s15, %s27_s15 }
   0xe   :  { %p211_p5 = scmp.ne.s32.totalorder %s27_s15, %s210_s19  ;;  %p216_p7 = scmp.lt.s32.totalorder %s210_s19, %s210_s19 }
  0x10   :  { %p217_p8 = por %p216_p7, %p215_p6 }
  0x12   :  { %p218_p9 = pnand %p217_p8, %p211_p5 }
  0x14   :  { %221 = shalt.err (!%p218_p9)
}
  0x15   :  { %s250_s20 = smov 128   ;;  %s251_s21 = smov 8  }
  0x16   :  { %32 = dma.hbm_to_vmem [thread:$0]  %s288_s1, 512, %s27_s15, [#allocation6], %s250_s20, %s250_s20, %s251_s21  }
  0x17   :  { %242 = dma.done.wait [#allocation3], 32  }
  0x18   :  { %243 = vsyncadd [#allocation3], 4294967264 }
  0x19   :  { %244 = dma.done.wait [#allocation6], 512  }
  0x1a   :  { %245 = vsyncadd [#allocation6], 4294966784  ;;  %v252_v0 = vmov 0.0   ;;  %vm253_vm0 = vmmov 0   ;;  %v52_v1 = vld [vmem:[#allocation5 + $0x18] sm:$0xff]  ;;  %v51_v2 = vld [vmem:[#allocation5 + $0x10] sm:$0xff] }
  0x1b   :  { %160 = vmatprep.subr.mxu0 %v252_v0  ;;  %168 = vmatprep.mubr.msk.f32.mxu0 %vm253_vm0, %v252_v0  ;;  %v41_v3 = vld [vmem:[#allocation2] sm:$0x3]  ;;  %v50_v4 = vld [vmem:[#allocation5 + $0x8] sm:$0xff]  ;;  %v49_v6 = vld [vmem:[#allocation5] sm:$0xff]  ;;  %vm60_vm1 = vcmask 261120   ;;  %s254_s24 = smov [#allocation7]  }
  0x1c   :  { %161 = vmatpush3.msra.mxu0 %v52_v1  ;;  %v152_v5 = vmul.f32 -1.442695, %v41_v3  ;;  %v153_v11 = vld [vmem:[%s289_s2] ss:$0 sm:$0xff]  ;;  %s142_s25 = sshll.u32 %s254_s24, 4  ;;  %vm134_vm2 = vcmask 517120   ;;  %s143_s25 = int_to_ptr.vmem [resolvable:$true] %s142_s25 }
  0x1d   :  { %162 = vmatprep.subr.mxu0 %v252_v0  ;;  %s222_s26 = scalar_lea.vmem %s143_s25, 32  ;;  %p227_p11 = scmp.lt.s32.totalorder %s143_s25, %s143_s25 }
  0x1e   :  { %163 = vmatpush3.msra.mxu0 %v51_v2  ;;  %178 = vpow2.f32 %v152_v5  ;;  %p223_p10 = scmp.ne.s32.totalorder %s143_s25, %s222_s26  ;;  %p228_p12 = scmp.lt.s32.totalorder %s222_s26, %s222_s26 }
  0x1f   :  { %164 = vmatprep.subr.mxu0 %v252_v0 }
  0x20   :  { %165 = vmatpush3.msra.mxu0 %v50_v4  ;;  %p229_p13 = por %p228_p12, %p227_p11 }
  0x21   :  { %166 = vmatprep.subr.mxu0 %v252_v0 }
  0x22   :  { %167 = vmatpush3.msra.mxu0 %v49_v6  ;;  %p230_p0 = pnand %p229_p13, %p223_p10 }
  0x2b   :  { %v179_v7 = vpop.eup %178 }
  0x2c   :  { %v45_v8 = vadd.f32 1.0, %v179_v7 }
  0x2e   :  { %180 = vrcp.f32 %v45_v8 }
  0x3b   :  { %v181_v9 = vpop.eup %180 }
  0x3c   :  { %v48_v10 = vmul.f32 %v181_v9, %v41_v3 }
  0x3e   :  { %169 = vmatmul.mubr.msk.f32.vlgmr.msra.gmra.mxu0 %vm60_vm1, %v48_v10 }
  0xfe   :  { %v130_v12 = vpop.f32.mrf.mxu0 }
  0xff   :  { %v131_v13 = vadd.f32 %v153_v11, %v130_v12 }
 0x100   :  { %v170_v14 = vpop.f32.mrf.mxu0 }
 0x101   :  { %135 = vst.msk [vmem:[#allocation7] sm:$0x3] %vm134_vm2, %v131_v13 }
 0x102   :  { %233 = shalt.err (!%p230_p0)
}
 0x103   :  { %145 = dma.vmem_to_hbm [thread:$0]  %s143_s25, 32, %s290_s3, [#allocation4]  }
 0x104   :  { %246 = dma.done.wait [#allocation4], 32  }
 0x105   :  { %247 = vsyncadd [#allocation4], 4294967264 }
 0x106   :  { %149 = vsyncpa [#allocation3], 1 }
 0x107   :  { %150 = vsyncpa [#allocation6], 1 }
 0x108   :  { %151 = vsyncpa [#allocation4], 1 }

</bundles_post_ra>
